<compile_context>
chip_gen: v5e
topology: v5e:2x2
jax: 0.10.0
libtpu: 0.0.40
codegen_flags: <defaults>
</compile_context>

<pallas_src>
import jax
import jax.numpy as jnp
from jax.experimental import pallas as pl
from jax.experimental.pallas import tpu as pltpu


def _round_up(n, m):
    return ((n + m - 1) // m) * m


def _vmem_budget_bytes():
    """~80% of this generation's per-core VMEM (headroom for compiler scratch)."""
    cap = None
    try:
        cap = getattr(pltpu.get_tpu_info(), "vmem_capacity_bytes", None)
    except Exception:
        cap = None
    if not cap:
        cap = 64 << 20  # conservative fallback: v7x per-TensorCore VMEM
    return int(cap * 0.8)


def _make_kernel(c, inv_hw, with_feature):
    def kernel(x_ref, w_emb_ref, b_emb_ref, w_fc_ref, b_fc_ref, *rest):
        pooled_ref = rest[-1]      # (TB, Cs) f32 scratch
        y_ref = rest[0]

        # The lane-padding tail of the pooled scratch must be zero (the matching weight
        # rows are zero, but uninitialized VMEM could hold NaN/Inf). Done every step so
        # it is also correct when the "parallel" axis is split across TensorCores
        # (each core has its own scratch and may never see grid step 0). Tiny cost.
        if c < pooled_ref.shape[1]:
            pooled_ref[...] = jnp.zeros_like(pooled_ref)

        # Global average pool over the spatial (lane) axis: one f32 reduction, 1/HW
        # folded into a constant multiply. No upcast copy of the streamed tile.
        pooled_ref[:, :c] = jnp.sum(x_ref[...], axis=2, dtype=jnp.float32) * inv_hw

        # Embedding projection Linear(C -> E), then classifier self.fc: Linear(E -> N).
        feat = jnp.dot(pooled_ref[...], w_emb_ref[...],
                       preferred_element_type=jnp.float32) + b_emb_ref[...]
        y_ref[...] = jnp.dot(feat, w_fc_ref[...],
                             preferred_element_type=jnp.float32) + b_fc_ref[...]
        if with_feature:
            rest[1][...] = feat

    return kernel


def contrastive_forward(x, w_emb, b_emb, w_fc, b_fc, return_feature=False):
    B, C, H, W = x.shape
    E = w_emb.shape[0]
    N = w_fc.shape[0]
    HW = H * W

    # Lane-aligned sizes for the small resident operands / outputs only
    # (x itself is streamed unpadded).
    Cs = _round_up(C, 128)      # contraction width of the pooled @ w_emb matmul
    Ep = _round_up(E, 128)
    Np = _round_up(N, 128)

    # ---- batch tile selection (VMEM-budget driven, per TPU generation) ----
    C_v = _round_up(C, 8)       # sublane padding of the x tile once in VMEM
    HW_v = _round_up(HW, 128)   # lane padding of the x tile once in VMEM
    w_bytes = 2 * ((Cs * Ep + Ep * Np) + (Ep + Np)) * 4        # worst case: double-buffered
    per_row = (2 * C_v * HW_v                                  # double-buffered x tile
               + Cs                                            # pooled scratch
               + 2 * Np                                        # double-buffered y tile
               + (2 * Ep if return_feature else 0)) * 4        # double-buffered feat tile
    budget = _vmem_budget_bytes()
    avail = budget - w_bytes - (4 << 20)                       # compiler-internal slack
    tb_budget = max(8, min(512, (avail // per_row) // 8 * 8)) if avail > 0 else 8
    # TODO(synk): if a single batch row (C_v * HW_v * 4 bytes) ever exceeds the budget,
    # an extra "arbitrary" grid axis over HW with a pooled accumulator would be needed.

    B8 = _round_up(B, 8)
    if B8 <= tb_budget:
        # Whole batch fits; give the grid 2 steps when cheap so the "parallel" axis can
        # span both TensorCores on v7x.
        TB = B8 // 2 if (B8 >= 16 and B8 % 16 == 0) else B8
    else:
        TB = tb_budget
    Bp = _round_up(B, TB)

    # x stays in its native dtype & layout: (B,C,H,W)->(B,C,HW) is a free reshape of
    # contiguous trailing dims. Batch is only padded (one copy) when B % TB != 0.
    x_in = x.reshape(B, C, HW)
    if Bp != B:
        x_in = jnp.pad(x_in, ((0, Bp - B), (0, 0), (0, 0)))

    # Pre-transposed / zero-padded resident weights (tiny, constant index maps).
    w_emb_t = jnp.pad(w_emb.astype(jnp.float32).T, ((0, Cs - C), (0, Ep - E)))   # (Cs, Ep)
    b_emb_p = jnp.pad(b_emb.astype(jnp.float32), (0, Ep - E)).reshape(1, Ep)
    w_fc_t = jnp.pad(w_fc.astype(jnp.float32).T, ((0, Ep - E), (0, Np - N)))     # (Ep, Np)
    b_fc_p = jnp.pad(b_fc.astype(jnp.float32), (0, Np - N)).reshape(1, Np)

    out_shape = [jax.ShapeDtypeStruct((Bp, Np), jnp.float32)]
    out_specs = [pl.BlockSpec((TB, Np), lambda i: (i, 0))]
    if return_feature:
        out_shape.append(jax.ShapeDtypeStruct((Bp, Ep), jnp.float32))
        out_specs.append(pl.BlockSpec((TB, Ep), lambda i: (i, 0)))

    def build(single_buffer_weights):
        # Weights/biases never change across grid steps -> single-buffer them to free
        # VMEM for larger x tiles (default double-buffers every input).
        wkw = {"pipeline_mode": pl.Buffered(1)} if single_buffer_weights else {}
        in_specs = [
            pl.BlockSpec((TB, C, HW), lambda i: (i, 0, 0)),     # streamed over batch
            pl.BlockSpec((Cs, Ep), lambda i: (0, 0), **wkw),    # resident weights
            pl.BlockSpec((1, Ep), lambda i: (0, 0), **wkw),
            pl.BlockSpec((Ep, Np), lambda i: (0, 0), **wkw),
            pl.BlockSpec((1, Np), lambda i: (0, 0), **wkw),
        ]
        return pl.pallas_call(
            _make_kernel(C, 1.0 / HW, return_feature),
            out_shape=tuple(out_shape),
            grid=(Bp // TB,),
            in_specs=in_specs,
            out_specs=tuple(out_specs),
            scratch_shapes=[pltpu.VMEM((TB, Cs), jnp.float32)],
            compiler_params=pltpu.CompilerParams(
                dimension_semantics=("parallel",),
                vmem_limit_bytes=int(budget)),
        )

    args = (x_in, w_emb_t, b_emb_p, w_fc_t, b_fc_p)
    try:
        outs = build(True)(*args)
    except Exception:
        # pipeline_mode single-buffering not supported on this jax version/backend;
        # fall back to the default (double-buffered) weight pipeline.
        outs = build(False)(*args)

    y = outs[0][:B, :N]
    if return_feature:
        return y, outs[1][:B, :E]
    return y


def _ref_forward(x, w_emb, b_emb, w_fc, b_fc):
    # Pure-JAX f32 reference of the same computation.
    pooled = jnp.mean(x.reshape(x.shape[0], x.shape[1], -1), axis=-1)
    feat = pooled @ w_emb.T + b_emb
    y = feat @ w_fc.T + b_fc
    return y, feat


if __name__ == "__main__":
    # Small shapes consistent with ContrastiveModels:
    #   x: (batch=2, channels=4, H=16, W=16), embedding_size=32, num_classes=2
    B, C, H, W = 2, 4, 16, 16
    embedding_size = 32
    num_classes = 2

    key = jax.random.PRNGKey(0)
    kx, k1, k2, k3, k4 = jax.random.split(key, 5)

    x = jax.random.normal(kx, (B, C, H, W), dtype=jnp.float32)

    # Deterministic Linear init (PyTorch-style uniform bounds, synthetic weights).
    bound_emb = 1.0 / (C ** 0.5)
    w_emb = jax.random.uniform(k1, (embedding_size, C), jnp.float32,
                               -bound_emb, bound_emb)
    b_emb = jax.random.uniform(k2, (embedding_size,), jnp.float32,
                               -bound_emb, bound_emb)

    bound_fc = 1.0 / (embedding_size ** 0.5)
    w_fc = jax.random.uniform(k3, (num_classes, embedding_size), jnp.float32,
                              -bound_fc, bound_fc)
    b_fc = jax.random.uniform(k4, (num_classes,), jnp.float32,
                              -bound_fc, bound_fc)

    # return_feature=True path.
    y_pred, feature = contrastive_forward(x, w_emb, b_emb, w_fc, b_fc,
                                          return_feature=True)
    jax.block_until_ready(y_pred)
    jax.block_until_ready(feature)

    # return_feature=False path (no feature HBM writeback).
    y_only = contrastive_forward(x, w_emb, b_emb, w_fc, b_fc,
                                 return_feature=False)
    jax.block_until_ready(y_only)

    # Correctness check against the pure-JAX f32 reference.
    y_ref, feat_ref = _ref_forward(x, w_emb, b_emb, w_fc, b_fc)
    assert y_pred.shape == (B, num_classes)
    assert feature.shape == (B, embedding_size)
    assert y_only.shape == (B, num_classes)
    assert jnp.allclose(y_pred, y_ref, atol=2e-3, rtol=2e-3)
    assert jnp.allclose(feature, feat_ref, atol=2e-3, rtol=2e-3)
    assert jnp.allclose(y_only, y_pred, atol=1e-6, rtol=1e-6)

    print("KERNEL_OK")
</pallas_src>

<mosaic_0001>
module attributes {stable_mosaic.version = 11 : i64} {
  func.func @kernel(%arg0: i32, %arg1: memref<8x4x256xf32, #tpu.memory_space<vmem>>, %arg2: memref<128x128xf32, #tpu.memory_space<vmem>>, %arg3: memref<1x128xf32, #tpu.memory_space<vmem>>, %arg4: memref<128x128xf32, #tpu.memory_space<vmem>>, %arg5: memref<1x128xf32, #tpu.memory_space<vmem>>, %arg6: memref<8x128xf32, #tpu.memory_space<vmem>>, %arg7: memref<8x128xf32, #tpu.memory_space<vmem>>, %arg8: memref<8x128xf32, #tpu.memory_space<vmem>>) attributes {dimension_semantics = [#tpu.dimension_semantics<parallel>], iteration_bounds = array<i64: 1>, scalar_prefetch = 0 : i64, scratch_operands = 1 : i64, tpu.core_type = #tpu.core_type<tc>, window_params = [{transform_indices = @transform_0, window_bounds = array<i64: 8, 4, 256>}, {pipeline_mode = #tpu.pipeline_mode<synchronous>, transform_indices = @transform_1, window_bounds = array<i64: 128, 128>}, {pipeline_mode = #tpu.pipeline_mode<synchronous>, transform_indices = @transform_2, window_bounds = array<i64: 1, 128>}, {pipeline_mode = #tpu.pipeline_mode<synchronous>, transform_indices = @transform_3, window_bounds = array<i64: 128, 128>}, {pipeline_mode = #tpu.pipeline_mode<synchronous>, transform_indices = @transform_4, window_bounds = array<i64: 1, 128>}, {transform_indices = @transform_5, window_bounds = array<i64: 8, 128>}, {transform_indices = @transform_6, window_bounds = array<i64: 8, 128>}]} {
    %cst = arith.constant 0.000000e+00 : f32
    %0 = vector.broadcast %cst : f32 to vector<8x128xf32>
    %c0 = arith.constant 0 : index
    %c0_0 = arith.constant 0 : index
    %1 = vector.load %arg8[%c0, %c0_0] : memref<8x128xf32, #tpu.memory_space<vmem>>, vector<8x128xf32>
    tpu.vector_store %arg8[%c0, %c0_0], %0 {strides = array<i32>} : memref<8x128xf32, #tpu.memory_space<vmem>>, vector<8x128xf32>,
    %c0_1 = arith.constant 0 : index
    %c0_2 = arith.constant 0 : index
    %c0_3 = arith.constant 0 : index
    %2 = vector.load %arg1[%c0_1, %c0_2, %c0_3] : memref<8x4x256xf32, #tpu.memory_space<vmem>>, vector<8x4x256xf32>
    %cst_4 = arith.constant dense<0.000000e+00> : vector<8x4xf32>
    %3 = vector.multi_reduction <add>, %2, %cst_4 [2] : vector<8x4x256xf32> to vector<8x4xf32>
    %cst_5 = arith.constant 3.906250e-03 : f32
    %4 = vector.broadcast %cst_5 : f32 to vector<8x4xf32>
    %5 = arith.mulf %3, %4 : vector<8x4xf32>
    %c0_6 = arith.constant 0 : index
    %c0_7 = arith.constant 0 : index
    %6 = vector.load %arg8[%c0_6, %c0_7] : memref<8x128xf32, #tpu.memory_space<vmem>>, vector<8x4xf32>
    tpu.vector_store %arg8[%c0_6, %c0_7], %5 {strides = array<i32>} : memref<8x128xf32, #tpu.memory_space<vmem>>, vector<8x4xf32>,
    %c0_8 = arith.constant 0 : index
    %c0_9 = arith.constant 0 : index
    %7 = vector.load %arg8[%c0_8, %c0_9] : memref<8x128xf32, #tpu.memory_space<vmem>>, vector<8x128xf32>
    %c0_10 = arith.constant 0 : index
    %c0_11 = arith.constant 0 : index
    %8 = vector.load %arg2[%c0_10, %c0_11] : memref<128x128xf32, #tpu.memory_space<vmem>>, vector<128x128xf32>
    %cst_12 = arith.constant dense<0.000000e+00> : vector<8x128xf32>
    %9 = tpu.matmul %7, %8, %cst_12 {dimension_numbers = #tpu.dot_dimension_numbers<[1], [0], [0], [1], [0, 0, 1, 1], [], []>} : vector<8x128xf32>, vector<128x128xf32>, vector<8x128xf32> -> vector<8x128xf32>
    %c0_13 = arith.constant 0 : index
    %c0_14 = arith.constant 0 : index
    %10 = vector.load %arg3[%c0_13, %c0_14] : memref<1x128xf32, #tpu.memory_space<vmem>>, vector<1x128xf32>
    %11 = vector.broadcast %10 : vector<1x128xf32> to vector<8x128xf32>
    %12 = arith.addf %9, %11 : vector<8x128xf32>
    %c0_15 = arith.constant 0 : index
    %c0_16 = arith.constant 0 : index
    %13 = vector.load %arg4[%c0_15, %c0_16] : memref<128x128xf32, #tpu.memory_space<vmem>>, vector<128x128xf32>
    %cst_17 = arith.constant dense<0.000000e+00> : vector<8x128xf32>
    %14 = tpu.matmul %12, %13, %cst_17 {dimension_numbers = #tpu.dot_dimension_numbers<[1], [0], [0], [1], [0, 0, 1, 1], [], []>} : vector<8x128xf32>, vector<128x128xf32>, vector<8x128xf32> -> vector<8x128xf32>
    %c0_18 = arith.constant 0 : index
    %c0_19 = arith.constant 0 : index
    %15 = vector.load %arg5[%c0_18, %c0_19] : memref<1x128xf32, #tpu.memory_space<vmem>>, vector<1x128xf32>
    %16 = vector.broadcast %15 : vector<1x128xf32> to vector<8x128xf32>
    %17 = arith.addf %14, %16 : vector<8x128xf32>
    %c0_20 = arith.constant 0 : index
    %c0_21 = arith.constant 0 : index
    %18 = vector.load %arg6[%c0_20, %c0_21] : memref<8x128xf32, #tpu.memory_space<vmem>>, vector<8x128xf32>
    tpu.vector_store %arg6[%c0_20, %c0_21], %17 {strides = array<i32>} : memref<8x128xf32, #tpu.memory_space<vmem>>, vector<8x128xf32>,
    %c0_22 = arith.constant 0 : index
    %c0_23 = arith.constant 0 : index
    %19 = vector.load %arg7[%c0_22, %c0_23] : memref<8x128xf32, #tpu.memory_space<vmem>>, vector<8x128xf32>
    tpu.vector_store %arg7[%c0_22, %c0_23], %12 {strides = array<i32>} : memref<8x128xf32, #tpu.memory_space<vmem>>, vector<8x128xf32>,
    return
  }
  func.func @transform_0(%arg0: i32) -> (i32, i32, i32) {
    %c0_i32 = arith.constant 0 : i32
    %c0_i32_0 = arith.constant 0 : i32
    %c0_i32_1 = arith.constant 0 : i32
    return %arg0, %c0_i32, %c0_i32_0 : i32, i32, i32
  }
  func.func @transform_1(%arg0: i32) -> (i32, i32) {
    %c0_i32 = arith.constant 0 : i32
    %c0_i32_0 = arith.constant 0 : i32
    %c0_i32_1 = arith.constant 0 : i32
    return %c0_i32, %c0_i32_0 : i32, i32
  }
  func.func @transform_2(%arg0: i32) -> (i32, i32) {
    %c0_i32 = arith.constant 0 : i32
    %c0_i32_0 = arith.constant 0 : i32
    %c0_i32_1 = arith.constant 0 : i32
    return %c0_i32, %c0_i32_0 : i32, i32
  }
  func.func @transform_3(%arg0: i32) -> (i32, i32) {
    %c0_i32 = arith.constant 0 : i32
    %c0_i32_0 = arith.constant 0 : i32
    %c0_i32_1 = arith.constant 0 : i32
    return %c0_i32, %c0_i32_0 : i32, i32
  }
  func.func @transform_4(%arg0: i32) -> (i32, i32) {
    %c0_i32 = arith.constant 0 : i32
    %c0_i32_0 = arith.constant 0 : i32
    %c0_i32_1 = arith.constant 0 : i32
    return %c0_i32, %c0_i32_0 : i32, i32
  }
  func.func @transform_5(%arg0: i32) -> (i32, i32) {
    %c0_i32 = arith.constant 0 : i32
    %c0_i32_0 = arith.constant 0 : i32
    return %arg0, %c0_i32 : i32, i32
  }
  func.func @transform_6(%arg0: i32) -> (i32, i32) {
    %c0_i32 = arith.constant 0 : i32
    %c0_i32_0 = arith.constant 0 : i32
    return %arg0, %c0_i32 : i32, i32
  }
}

module attributes {stable_mosaic.version = 11 : i64} {
  func.func @kernel(%arg0: i32, %arg1: memref<8x4x256xf32, #tpu.memory_space<vmem>>, %arg2: memref<128x128xf32, #tpu.memory_space<vmem>>, %arg3: memref<1x128xf32, #tpu.memory_space<vmem>>, %arg4: memref<128x128xf32, #tpu.memory_space<vmem>>, %arg5: memref<1x128xf32, #tpu.memory_space<vmem>>, %arg6: memref<8x128xf32, #tpu.memory_space<vmem>>, %arg7: memref<8x128xf32, #tpu.memory_space<vmem>>, %arg8: memref<8x128xf32, #tpu.memory_space<vmem>>) attributes {dimension_semantics = [#tpu.dimension_semantics<parallel>], iteration_bounds = array<i64: 1>, scalar_prefetch = 0 : i64, scratch_operands = 1 : i64, tpu.core_type = #tpu.core_type<tc>, window_params = [{transform_indices = @transform_0, window_bounds = array<i64: 8, 4, 256>}, {pipeline_mode = #tpu.pipeline_mode<synchronous>, transform_indices = @transform_1, window_bounds = array<i64: 128, 128>}, {pipeline_mode = #tpu.pipeline_mode<synchronous>, transform_indices = @transform_2, window_bounds = array<i64: 1, 128>}, {pipeline_mode = #tpu.pipeline_mode<synchronous>, transform_indices = @transform_3, window_bounds = array<i64: 128, 128>}, {pipeline_mode = #tpu.pipeline_mode<synchronous>, transform_indices = @transform_4, window_bounds = array<i64: 1, 128>}, {transform_indices = @transform_5, window_bounds = array<i64: 8, 128>}, {transform_indices = @transform_6, window_bounds = array<i64: 8, 128>}]} {
    %cst = arith.constant 0.000000e+00 : f32
    %0 = vector.broadcast %cst : f32 to vector<8x128xf32>
    %c0 = arith.constant 0 : index
    %c0_0 = arith.constant 0 : index
    %1 = vector.load %arg8[%c0, %c0_0] : memref<8x128xf32, #tpu.memory_space<vmem>>, vector<8x128xf32>
    tpu.vector_store %arg8[%c0, %c0_0], %0 {strides = array<i32>} : memref<8x128xf32, #tpu.memory_space<vmem>>, vector<8x128xf32>,
    %c0_1 = arith.constant 0 : index
    %c0_2 = arith.constant 0 : index
    %c0_3 = arith.constant 0 : index
    %2 = vector.load %arg1[%c0_1, %c0_2, %c0_3] : memref<8x4x256xf32, #tpu.memory_space<vmem>>, vector<8x4x256xf32>
    %cst_4 = arith.constant dense<0.000000e+00> : vector<8x4xf32>
    %3 = vector.multi_reduction <add>, %2, %cst_4 [2] : vector<8x4x256xf32> to vector<8x4xf32>
    %cst_5 = arith.constant 3.906250e-03 : f32
    %4 = vector.broadcast %cst_5 : f32 to vector<8x4xf32>
    %5 = arith.mulf %3, %4 : vector<8x4xf32>
    %c0_6 = arith.constant 0 : index
    %c0_7 = arith.constant 0 : index
    %6 = vector.load %arg8[%c0_6, %c0_7] : memref<8x128xf32, #tpu.memory_space<vmem>>, vector<8x4xf32>
    tpu.vector_store %arg8[%c0_6, %c0_7], %5 {strides = array<i32>} : memref<8x128xf32, #tpu.memory_space<vmem>>, vector<8x4xf32>,
    %c0_8 = arith.constant 0 : index
    %c0_9 = arith.constant 0 : index
    %7 = vector.load %arg8[%c0_8, %c0_9] : memref<8x128xf32, #tpu.memory_space<vmem>>, vector<8x128xf32>
    %c0_10 = arith.constant 0 : index
    %c0_11 = arith.constant 0 : index
    %8 = vector.load %arg2[%c0_10, %c0_11] : memref<128x128xf32, #tpu.memory_space<vmem>>, vector<128x128xf32>
    %cst_12 = arith.constant dense<0.000000e+00> : vector<8x128xf32>
    %9 = tpu.matmul %7, %8, %cst_12 {dimension_numbers = #tpu.dot_dimension_numbers<[1], [0], [0], [1], [0, 0, 1, 1], [], []>} : vector<8x128xf32>, vector<128x128xf32>, vector<8x128xf32> -> vector<8x128xf32>
    %c0_13 = arith.constant 0 : index
    %c0_14 = arith.constant 0 : index
    %10 = vector.load %arg3[%c0_13, %c0_14] : memref<1x128xf32, #tpu.memory_space<vmem>>, vector<1x128xf32>
    %11 = vector.broadcast %10 : vector<1x128xf32> to vector<8x128xf32>
    %12 = arith.addf %9, %11 : vector<8x128xf32>
    %c0_15 = arith.constant 0 : index
    %c0_16 = arith.constant 0 : index
    %13 = vector.load %arg4[%c0_15, %c0_16] : memref<128x128xf32, #tpu.memory_space<vmem>>, vector<128x128xf32>
    %cst_17 = arith.constant dense<0.000000e+00> : vector<8x128xf32>
    %14 = tpu.matmul %12, %13, %cst_17 {dimension_numbers = #tpu.dot_dimension_numbers<[1], [0], [0], [1], [0, 0, 1, 1], [], []>} : vector<8x128xf32>, vector<128x128xf32>, vector<8x128xf32> -> vector<8x128xf32>
    %c0_18 = arith.constant 0 : index
    %c0_19 = arith.constant 0 : index
    %15 = vector.load %arg5[%c0_18, %c0_19] : memref<1x128xf32, #tpu.memory_space<vmem>>, vector<1x128xf32>
    %16 = vector.broadcast %15 : vector<1x128xf32> to vector<8x128xf32>
    %17 = arith.addf %14, %16 : vector<8x128xf32>
    %c0_20 = arith.constant 0 : index
    %c0_21 = arith.constant 0 : index
    %18 = vector.load %arg6[%c0_20, %c0_21] : memref<8x128xf32, #tpu.memory_space<vmem>>, vector<8x128xf32>
    tpu.vector_store %arg6[%c0_20, %c0_21], %17 {strides = array<i32>} : memref<8x128xf32, #tpu.memory_space<vmem>>, vector<8x128xf32>,
    %c0_22 = arith.constant 0 : index
    %c0_23 = arith.constant 0 : index
    %19 = vector.load %arg7[%c0_22, %c0_23] : memref<8x128xf32, #tpu.memory_space<vmem>>, vector<8x128xf32>
    tpu.vector_store %arg7[%c0_22, %c0_23], %12 {strides = array<i32>} : memref<8x128xf32, #tpu.memory_space<vmem>>, vector<8x128xf32>,
    return
  }
  func.func @transform_0(%arg0: i32) -> (i32, i32, i32) {
    %c0_i32 = arith.constant 0 : i32
    %c0_i32_0 = arith.constant 0 : i32
    %c0_i32_1 = arith.constant 0 : i32
    return %arg0, %c0_i32, %c0_i32_0 : i32, i32, i32
  }
  func.func @transform_1(%arg0: i32) -> (i32, i32) {
    %c0_i32 = arith.constant 0 : i32
    %c0_i32_0 = arith.constant 0 : i32
    %c0_i32_1 = arith.constant 0 : i32
    return %c0_i32, %c0_i32_0 : i32, i32
  }
  func.func @transform_2(%arg0: i32) -> (i32, i32) {
    %c0_i32 = arith.constant 0 : i32
    %c0_i32_0 = arith.constant 0 : i32
    %c0_i32_1 = arith.constant 0 : i32
    return %c0_i32, %c0_i32_0 : i32, i32
  }
  func.func @transform_3(%arg0: i32) -> (i32, i32) {
    %c0_i32 = arith.constant 0 : i32
    %c0_i32_0 = arith.constant 0 : i32
    %c0_i32_1 = arith.constant 0 : i32
    return %c0_i32, %c0_i32_0 : i32, i32
  }
  func.func @transform_4(%arg0: i32) -> (i32, i32) {
    %c0_i32 = arith.constant 0 : i32
    %c0_i32_0 = arith.constant 0 : i32
    %c0_i32_1 = arith.constant 0 : i32
    return %c0_i32, %c0_i32_0 : i32, i32
  }
  func.func @transform_5(%arg0: i32) -> (i32, i32) {
    %c0_i32 = arith.constant 0 : i32
    %c0_i32_0 = arith.constant 0 : i32
    return %arg0, %c0_i32 : i32, i32
  }
  func.func @transform_6(%arg0: i32) -> (i32, i32) {
    %c0_i32 = arith.constant 0 : i32
    %c0_i32_0 = arith.constant 0 : i32
    return %arg0, %c0_i32 : i32, i32
  }
}

</mosaic_0001>

<bundles_post_ra>
// kernel: tpu_custom_call.1
= control target key start
LH: loop header
LB: loop body
LE: loop exit
PB: predicated region body
PF: predicated region fallthrough
CT: control target
= control target key end

     0   :  { %12 = vsyncpa [#allocation4], 0  ;;  %s550_s0 = inlined_call_operand.hbm [shape: f32[8,4,256], index: 0, kind: input, shape index: {}]   ;;  %s551_s1 = inlined_call_operand.hbm [shape: f32[128,128], index: 1, kind: input, shape index: {}]   ;;  %s552_s2 = inlined_call_operand.vmem [shape: f32[1,128], index: 2, kind: input, shape index: {}]   ;;  %s553_s3 = inlined_call_operand.hbm [shape: f32[128,128], index: 3, kind: input, shape index: {}]   ;;  %s554_s4 = inlined_call_operand.vmem [shape: f32[1,128], index: 4, kind: input, shape index: {}]   ;;  %s555_s5 = inlined_call_operand.hbm [shape: f32[8,128], index: 5, kind: output, shape index: {0}]   ;;  %s556_s6 = inlined_call_operand.hbm [shape: f32[8,128], index: 6, kind: output, shape index: {1}]  }
   0x1   :  { %13 = vsyncpa [#allocation7], 0 }
   0x2   :  { %14 = vsyncpa [#allocation5], 0 }
   0x3   :  { %15 = vsyncpa [#allocation11], 0  ;;  %s33_s23 = sshll.u32 %s551_s1, 4  ;;  %s470_s24 = smov [#allocation6]   ;;  %s34_s23 = int_to_ptr.hbm [resolvable:$true] %s33_s23 }
   0x4   :  { %s35_s25 = sshll.u32 %s470_s24, 4  ;;  %s20_s28 = sshll.u32 %s550_s0, 4  ;;  %s36_s25 = int_to_ptr.vmem [resolvable:$true] %s35_s25  ;;  %s21_s28 = int_to_ptr.hbm [resolvable:$true] %s20_s28 }
   0x5   :  { %s471_s29 = smov 128   ;;  %s472_s30 = smov 8  }
   0x6   :  { %41 = dma.hbm_to_vmem [thread:$0]  %s34_s23, 2048, %s36_s25, [#allocation7], %s471_s29, %s471_s29, %s472_s30  }
   0x7   :  { %s473_s7 = smov [#allocation3]   ;;  %s48_s11 = sshll.u32 %s553_s3, 4  ;;  %s49_s11 = int_to_ptr.hbm [resolvable:$true] %s48_s11 }
   0x8   :  { %s22_s8 = sshll.u32 %s473_s7, 4  ;;  %s474_s1 = smov [#allocation8]   ;;  %s23_s8 = int_to_ptr.vmem [resolvable:$true] %s22_s8 }
   0x9   :  { %28 = dma.hbm_to_vmem [thread:$0]  %s21_s28, 1024, %s23_s8, [#allocation4], %s471_s29, %s471_s29, %s472_s30  }
   0xa   :  { %s50_s12 = sshll.u32 %s474_s1, 4  ;;  %s51_s12 = int_to_ptr.vmem [resolvable:$true] %s50_s12 }
   0xb   :  { %56 = dma.hbm_to_vmem [thread:$0]  %s49_s11, 2048, %s51_s12, [#allocation7], %s471_s29, %s471_s29, %s472_s30  }
   0xc   :  { %462 = dma.done.wait [#allocation4], 1024  }
   0xd   :  { %463 = vsyncadd [#allocation4], 4294966272 }
   0xe   :  { %464 = dma.done.wait [#allocation7], 4096  }
   0xf   :  { %465 = vsyncadd [#allocation7], 4294963200  ;;  %v72_v0 = vld [vmem:[#allocation3] sm:$0xff]  ;;  %v74_v1 = vld [vmem:[#allocation3 + $0x10] sm:$0xff]  ;;  %vm131_vm0 = vcmask 1043456   ;;  %v475_v60 = vmov 0.0  }
  0x10   :  { %88 = vst [vmem:[#allocation1] ss:$2 sm:$0xff] %v72_v0  ;;  %v73_v2 = vld [vmem:[#allocation3 + $0x8] sm:$0xff]  ;;  %v75_v3 = vld [vmem:[#allocation3 + $0x18] sm:$0xff]  ;;  %v76_v4 = vld [vmem:[#allocation3 + $0x20] sm:$0xff]  ;;  %vm198_vm1 = vcmask 1041409  }
  0x11   :  { %96 = vst [vmem:[#allocation1 + $0x20] ss:$2 sm:$0xff] %v74_v1  ;;  %v78_v5 = vld [vmem:[#allocation3 + $0x30] sm:$0xff]  ;;  %v77_v10 = vld [vmem:[#allocation3 + $0x28] sm:$0xff]  ;;  %v79_v16 = vld [vmem:[#allocation3 + $0x38] sm:$0xff]  ;;  %vm200_vm2 = vcmask 1042434  }
  0x12   :  { %92 = vst [vmem:[#allocation1 + $0x10] ss:$2 sm:$0xff] %v73_v2  ;;  %v231_v48 = vld [vmem:[#allocation6 + $0x78] sm:$0xff]  ;;  %v230_v49 = vld [vmem:[#allocation6 + $0x70] sm:$0xff]  ;;  %v229_v50 = vld [vmem:[#allocation6 + $0x68] sm:$0xff]  ;;  %vm202_vm3 = vcmask 1043459  }
  0x13   :  { %100 = vst [vmem:[#allocation1 + $0x30] ss:$2 sm:$0xff] %v75_v3  ;;  %236 = vmatpush.msra.mxu0 %v231_v48  ;;  %v228_v51 = vld [vmem:[#allocation6 + $0x60] sm:$0xff]  ;;  %v227_v52 = vld [vmem:[#allocation6 + $0x58] sm:$0xff]  ;;  %v226_v53 = vld [vmem:[#allocation6 + $0x50] sm:$0xff]  ;;  %vm204_vm4 = vcmask 1044484  }
  0x14   :  { %v225_v54 = vld [vmem:[#allocation6 + $0x48] sm:$0xff]  ;;  %v224_v55 = vld [vmem:[#allocation6 + $0x40] sm:$0xff]  ;;  %v223_v56 = vld [vmem:[#allocation6 + $0x38] sm:$0xff]  ;;  %71 = vst [vmem:[#allocation2] sm:$0xff] %v475_v60  ;;  %vm206_vm5 = vcmask 1045509   ;;  %vm208_vm6 = vcmask 1046534  }
  0x15   :  { %237 = vmatpush.msra.mxu0 %v230_v49  ;;  %v222_v57 = vld [vmem:[#allocation6 + $0x30] sm:$0xff]  ;;  %v221_v58 = vld [vmem:[#allocation6 + $0x28] sm:$0xff]  ;;  %v220_v59 = vld [vmem:[#allocation6 + $0x20] sm:$0xff]  ;;  %vm210_vm7 = vcmask 1047559   ;;  %vm213_vm8 = vcmask 31744   ;;  %s476_s13 = smov [#allocation10]  }
  0x16   :  { %v219_v61 = vld [vmem:[#allocation6 + $0x18] sm:$0xff]  ;;  %v218_v62 = vld [vmem:[#allocation6 + $0x10] sm:$0xff]  ;;  %v217_v63 = vld [vmem:[#allocation6 + $0x8] sm:$0xff]  ;;  %s314_s14 = sshll.u32 %s476_s13, 4  ;;  %s316_s17 = sshll.u32 %s556_s6, 4  ;;  %s315_s14 = int_to_ptr.vmem [resolvable:$true] %s314_s14  ;;  %s317_s17 = int_to_ptr.hbm [resolvable:$true] %s316_s17 }
  0x17   :  { %v89_v6 = vld.sshfl [vmem:[#allocation1] sm:$0xff pattern:$0x75316420]  ;;  %v90_v7 = vld.sshfl [vmem:[#allocation1 + $0x8] sm:$0xff pattern:$0x75316420]  ;;  %238 = vmatpush.msra.mxu0 %v229_v50 }
  0x18   :  { %v132_v8 = vsel %vm131_vm0, %v89_v6, 0.0  ;;  %v133_v9 = vsel %vm131_vm0, %v90_v7, 0.0  ;;  %103 = vst [vmem:[#allocation1] ss:$2 sm:$0xff] %v76_v4  ;;  %v216_v0 = vld [vmem:[#allocation6] sm:$0xff]  ;;  %v271_v2 = vld [vmem:[#allocation8 + $0x78] sm:$0xff]  ;;  %v188_v6 = vlaneseq }
  0x19   :  { %v134_v11 = vadd.f32 %v133_v9, %v132_v8  ;;  %v97_v12 = vld.sshfl [vmem:[#allocation1 + $0x20] sm:$0xff pattern:$0x75316420]  ;;  %v98_v13 = vld.sshfl [vmem:[#allocation1 + $0x28] sm:$0xff pattern:$0x75316420]  ;;  %239 = vmatpush.msra.mxu0 %v228_v51  ;;  %276 = vmatpush.msra.mxu1 %v271_v2 }
  0x1a   :  { %v142_v14 = vsel %vm131_vm0, %v97_v12, 0.0  ;;  %v143_v15 = vsel %vm131_vm0, %v98_v13, 0.0  ;;  %109 = vst [vmem:[#allocation1 + $0x20] ss:$2 sm:$0xff] %v78_v5  ;;  %v270_v3 = vld [vmem:[#allocation8 + $0x70] sm:$0xff]  ;;  %v269_v5 = vld [vmem:[#allocation8 + $0x68] sm:$0xff] }
  0x1b   :  { %135 = vadd.xlane.f32.xlu0 %v134_v11  ;;  %v144_v17 = vadd.f32 %v143_v15, %v142_v14  ;;  %v93_v18 = vld.sshfl [vmem:[#allocation1 + $0x10] sm:$0xff pattern:$0x75316420]  ;;  %v94_v19 = vld.sshfl [vmem:[#allocation1 + $0x18] sm:$0xff pattern:$0x75316420]  ;;  %240 = vmatpush.msra.mxu0 %v227_v52 }
  0x1c   :  { %106 = vst [vmem:[#allocation1 + $0x10] ss:$2 sm:$0xff] %v77_v10  ;;  %v137_v20 = vsel %vm131_vm0, %v93_v18, 0.0  ;;  %v138_v21 = vsel %vm131_vm0, %v94_v19, 0.0  ;;  %277 = vmatpush.msra.mxu1 %v270_v3  ;;  %v268_v7 = vld [vmem:[#allocation8 + $0x60] sm:$0xff]  ;;  %v267_v8 = vld [vmem:[#allocation8 + $0x58] sm:$0xff] }
  0x1d   :  { %145 = vadd.xlane.f32.xlu1 %v144_v17  ;;  %v101_v22 = vld.sshfl [vmem:[#allocation1 + $0x30] sm:$0xff pattern:$0x75316420]  ;;  %v102_v23 = vld.sshfl [vmem:[#allocation1 + $0x38] sm:$0xff pattern:$0x75316420]  ;;  %v139_v26 = vadd.f32 %v138_v21, %v137_v20  ;;  %241 = vmatpush.msra.mxu0 %v226_v53 }
  0x1e   :  { %112 = vst [vmem:[#allocation1 + $0x30] ss:$2 sm:$0xff] %v79_v16  ;;  %v147_v24 = vsel %vm131_vm0, %v101_v22, 0.0  ;;  %v148_v25 = vsel %vm131_vm0, %v102_v23, 0.0  ;;  %278 = vmatpush.msra.mxu1 %v269_v5  ;;  %v189_v9 = vand.u32 127, %v188_v6  ;;  %v266_v14 = vld [vmem:[#allocation8 + $0x50] sm:$0xff] }
  0x1f   :  { %v104_v27 = vld.sshfl [vmem:[#allocation1] sm:$0xff pattern:$0x75316420]  ;;  %v105_v28 = vld.sshfl [vmem:[#allocation1 + $0x8] sm:$0xff pattern:$0x75316420]  ;;  %v149_v32 = vadd.f32 %v148_v25, %v147_v24  ;;  %242 = vmatpush.msra.mxu0 %v225_v54 }
  0x20   :  { %v152_v29 = vsel %vm131_vm0, %v104_v27, 0.0  ;;  %v153_v30 = vsel %vm131_vm0, %v105_v28, 0.0  ;;  %279 = vmatpush.msra.mxu1 %v268_v7  ;;  %v265_v17 = vld [vmem:[#allocation8 + $0x48] sm:$0xff]  ;;  %v264_v22 = vld [vmem:[#allocation8 + $0x40] sm:$0xff]  ;;  %v263_v27 = vld [vmem:[#allocation8 + $0x38] sm:$0xff]  ;;  %s477_s20 = smov [#allocation9]  }
  0x21   :  { %v154_v31 = vadd.f32 %v153_v30, %v152_v29  ;;  %v110_v33 = vld.sshfl [vmem:[#allocation1 + $0x20] sm:$0xff pattern:$0x75316420]  ;;  %v111_v34 = vld.sshfl [vmem:[#allocation1 + $0x28] sm:$0xff pattern:$0x75316420]  ;;  %243 = vmatpush.msra.mxu0 %v224_v55 }
  0x22   :  { %v162_v39 = vsel %vm131_vm0, %v110_v33, 0.0  ;;  %v163_v40 = vsel %vm131_vm0, %v111_v34, 0.0  ;;  %280 = vmatpush.msra.mxu1 %v267_v8  ;;  %v262_v30 = vld [vmem:[#allocation8 + $0x30] sm:$0xff]  ;;  %v257_v49 = vld [vmem:[#allocation8 + $0x8] sm:$0xff]  ;;  %v256_v50 = vld [vmem:[#allocation8] sm:$0xff]  ;;  %s303_s21 = sshll.u32 %s477_s20, 4  ;;  %s304_s21 = int_to_ptr.vmem [resolvable:$true] %s303_s21 }
  0x23   :  { %140 = vadd.xlane.f32.xlu0 %v139_v26  ;;  %155 = vadd.xlane.f32.xlu2 %v154_v31  ;;  %v107_v35 = vld.sshfl [vmem:[#allocation1 + $0x10] sm:$0xff pattern:$0x75316420]  ;;  %v108_v36 = vld.sshfl [vmem:[#allocation1 + $0x18] sm:$0xff pattern:$0x75316420]  ;;  %v164_v46 = vadd.f32 %v163_v40, %v162_v39 }
  0x24   :  { %v157_v37 = vsel %vm131_vm0, %v107_v35, 0.0  ;;  %v158_v38 = vsel %vm131_vm0, %v108_v36, 0.0  ;;  %244 = vmatpush.msra.mxu0 %v223_v56  ;;  %281 = vmatpush.msra.mxu1 %v266_v14  ;;  %v261_v36 = vld [vmem:[#allocation8 + $0x28] sm:$0xff]  ;;  %v340_v51 = vld [vmem:[%s552_s2] ss:$0 sm:$0xff]  ;;  %s305_s23 = sshll.u32 %s555_s5, 4  ;;  %s306_s23 = int_to_ptr.hbm [resolvable:$true] %s305_s23 }
  0x25   :  { %150 = vadd.xlane.f32.xlu1 %v149_v32  ;;  %v113_v41 = vld.sshfl [vmem:[#allocation1 + $0x30] sm:$0xff pattern:$0x75316420]  ;;  %v114_v42 = vld.sshfl [vmem:[#allocation1 + $0x38] sm:$0xff pattern:$0x75316420]  ;;  %v159_v45 = vadd.f32 %v158_v38, %v157_v37 }
  0x26   :  { %v167_v43 = vsel %vm131_vm0, %v113_v41, 0.0  ;;  %v168_v44 = vsel %vm131_vm0, %v114_v42, 0.0  ;;  %245 = vmatpush.msra.mxu0 %v222_v57  ;;  %282 = vmatpush.msra.mxu1 %v265_v17  ;;  %v260_v41 = vld [vmem:[#allocation8 + $0x20] sm:$0xff]  ;;  %v341_v54 = vld [vmem:[%s554_s4] ss:$0 sm:$0xff] }
  0x27   :  { %v169_v47 = vadd.f32 %v168_v44, %v167_v43 }
  0x28   :  { %246 = vmatpush.msra.mxu0 %v221_v58  ;;  %283 = vmatpush.msra.mxu1 %v264_v22 }
  0x2a   :  { %247 = vmatpush.msra.mxu0 %v220_v59  ;;  %284 = vmatpush.msra.mxu1 %v263_v27 }
  0x2b   :  { %160 = vadd.xlane.f32.xlu2 %v159_v45  ;;  %165 = vadd.xlane.f32.xlu0 %v164_v46  ;;  %v259_v45 = vld [vmem:[#allocation8 + $0x18] sm:$0xff] }
  0x2c   :  { %248 = vmatpush.msra.mxu0 %v219_v61  ;;  %285 = vmatpush.msra.mxu1 %v262_v30 }
  0x2d   :  { %170 = vadd.xlane.f32.xlu1 %v169_v47  ;;  %v258_v47 = vld [vmem:[#allocation8 + $0x10] sm:$0xff] }
  0x2e   :  { %249 = vmatpush.msra.mxu0 %v218_v62  ;;  %286 = vmatpush.msra.mxu1 %v261_v36 }
  0x30   :  { %250 = vmatpush.msra.mxu0 %v217_v63  ;;  %287 = vmatpush.msra.mxu1 %v260_v41 }
  0x32   :  { %251 = vmatpush.msra.mxu0 %v216_v0  ;;  %288 = vmatpush.msra.mxu1 %v259_v45 }
  0x34   :  { %289 = vmatpush.msra.mxu1 %v258_v47 }
  0x36   :  { %290 = vmatpush.msra.mxu1 %v257_v49 }
  0x38   :  { %291 = vmatpush.msra.mxu1 %v256_v50 }
  0x8e   :  { %v136_v1 = vpop.xlane.xlu0 %135 }
  0x8f   :  { %v172_v10 = vmul.f32 0.00390625, %v136_v1 }
  0x90   :  { %v146_v4 = vpop.xlane.xlu1 %145 }
  0x91   :  { %v174_v11 = vmul.f32 0.00390625, %v146_v4  ;;  %v190_v18 = vperm.slane %v172_v10, %v189_v9 }
  0x93   :  { %v192_v21 = vperm.slane %v174_v11, %v189_v9 }
  0x96   :  { %v141_v12 = vpop.xlane.xlu0 %140  ;;  %v156_v13 = vpop.xlane.xlu2 %155 }
  0x97   :  { %v173_v15 = vmul.f32 0.00390625, %v141_v12  ;;  %v176_v25 = vmul.f32 0.00390625, %v156_v13 }
  0x98   :  { %v151_v16 = vpop.xlane.xlu1 %150 }
  0x99   :  { %v191_v19 = vperm.slane %v173_v15, %v189_v9  ;;  %v175_v20 = vmul.f32 0.00390625, %v151_v16  ;;  %v194_v34 = vperm.slane %v176_v25, %v189_v9 }
  0x9b   :  { %v199_v23 = vsel %vm198_vm1, %v191_v19, %v190_v18  ;;  %v193_v24 = vperm.slane %v175_v20, %v189_v9 }
  0x9c   :  { %v201_v26 = vsel %vm200_vm2, %v192_v21, %v199_v23 }
  0x9d   :  { %v203_v31 = vsel %vm202_vm3, %v193_v24, %v201_v26 }
  0x9e   :  { %v161_v28 = vpop.xlane.xlu2 %160  ;;  %v166_v29 = vpop.xlane.xlu0 %165  ;;  %v205_v40 = vsel %vm204_vm4, %v194_v34, %v203_v31 }
  0x9f   :  { %v177_v32 = vmul.f32 0.00390625, %v161_v28  ;;  %v178_v33 = vmul.f32 0.00390625, %v166_v29 }
  0xa0   :  { %v171_v35 = vpop.xlane.xlu1 %170 }
  0xa1   :  { %v195_v37 = vperm.slane %v177_v32, %v189_v9  ;;  %v196_v38 = vperm.slane %v178_v33, %v189_v9  ;;  %v179_v39 = vmul.f32 0.00390625, %v171_v35 }
  0xa3   :  { %v207_v42 = vsel %vm206_vm5, %v195_v37, %v205_v40  ;;  %v197_v43 = vperm.slane %v179_v39, %v189_v9 }
  0xa4   :  { %v209_v44 = vsel %vm208_vm6, %v196_v38, %v207_v42 }
  0xa5   :  { %v211_v46 = vsel %vm210_vm7, %v197_v43, %v209_v44 }
  0xa6   :  { %214 = vst.msk [vmem:[#allocation2] sm:$0xff] %vm213_vm8, %v211_v46 }
  0xad   :  { %v215_v48 = vld [vmem:[#allocation2] sm:$0xff] }
  0xae   :  { %252 = vmatmul.f32.vlgmr.msra.gmra.mxu0 %v215_v48 }
 0x12b   :  { %v253_v52 = vpop.f32.mrf.mxu0 }
 0x12c   :  { %v254_v53 = vadd.f32 %v340_v51, %v253_v52 }
 0x12e   :  { %297 = vst [vmem:[#allocation10] sm:$0xff] %v254_v53  ;;  %292 = vmatmul.f32.vlgmr.msra.gmra.mxu1 %v254_v53 }
 0x12f   :  { %319 = dma.vmem_to_hbm [thread:$0]  %s315_s14, 128, %s317_s17, [#allocation11]  }
 0x1ab   :  { %v293_v55 = vpop.f32.mrf.mxu1 }
 0x1ac   :  { %v294_v56 = vadd.f32 %v341_v54, %v293_v55 }
 0x1ae   :  { %296 = vst [vmem:[#allocation9] sm:$0xff] %v294_v56 }
 0x1af   :  { %308 = dma.vmem_to_hbm [thread:$0]  %s304_s21, 128, %s306_s23, [#allocation5]  }
 0x1b0   :  { %466 = dma.done.wait [#allocation5], 128  }
 0x1b1   :  { %467 = vsyncadd [#allocation5], 4294967168 }
 0x1b2   :  { %468 = dma.done.wait [#allocation11], 128  }
 0x1b3   :  { %469 = vsyncadd [#allocation11], 4294967168 }
 0x1b4   :  { %328 = vsyncpa [#allocation4], 1 }
 0x1b5   :  { %329 = vsyncpa [#allocation7], 1 }
 0x1b6   :  { %330 = vsyncpa [#allocation5], 1 }
 0x1b7   :  { %331 = vsyncpa [#allocation11], 1 }

// kernel: tpu_custom_call.1
= control target key start
LH: loop header
LB: loop body
LE: loop exit
PB: predicated region body
PF: predicated region fallthrough
CT: control target
= control target key end

     0   :  { %12 = vsyncpa [#allocation4], 0  ;;  %s550_s0 = inlined_call_operand.hbm [shape: f32[8,4,256], index: 0, kind: input, shape index: {}]   ;;  %s551_s1 = inlined_call_operand.hbm [shape: f32[128,128], index: 1, kind: input, shape index: {}]   ;;  %s552_s2 = inlined_call_operand.vmem [shape: f32[1,128], index: 2, kind: input, shape index: {}]   ;;  %s553_s3 = inlined_call_operand.hbm [shape: f32[128,128], index: 3, kind: input, shape index: {}]   ;;  %s554_s4 = inlined_call_operand.vmem [shape: f32[1,128], index: 4, kind: input, shape index: {}]   ;;  %s555_s5 = inlined_call_operand.hbm [shape: f32[8,128], index: 5, kind: output, shape index: {0}]   ;;  %s556_s6 = inlined_call_operand.hbm [shape: f32[8,128], index: 6, kind: output, shape index: {1}]  }
   0x1   :  { %13 = vsyncpa [#allocation7], 0 }
   0x2   :  { %14 = vsyncpa [#allocation5], 0 }
   0x3   :  { %15 = vsyncpa [#allocation11], 0  ;;  %s33_s23 = sshll.u32 %s551_s1, 4  ;;  %s470_s24 = smov [#allocation6]   ;;  %s34_s23 = int_to_ptr.hbm [resolvable:$true] %s33_s23 }
   0x4   :  { %s35_s25 = sshll.u32 %s470_s24, 4  ;;  %s20_s28 = sshll.u32 %s550_s0, 4  ;;  %s36_s25 = int_to_ptr.vmem [resolvable:$true] %s35_s25  ;;  %s21_s28 = int_to_ptr.hbm [resolvable:$true] %s20_s28 }
   0x5   :  { %s471_s29 = smov 128   ;;  %s472_s30 = smov 8  }
   0x6   :  { %41 = dma.hbm_to_vmem [thread:$0]  %s34_s23, 2048, %s36_s25, [#allocation7], %s471_s29, %s471_s29, %s472_s30  }
   0x7   :  { %s473_s7 = smov [#allocation3]   ;;  %s48_s11 = sshll.u32 %s553_s3, 4  ;;  %s49_s11 = int_to_ptr.hbm [resolvable:$true] %s48_s11 }
   0x8   :  { %s22_s8 = sshll.u32 %s473_s7, 4  ;;  %s474_s1 = smov [#allocation8]   ;;  %s23_s8 = int_to_ptr.vmem [resolvable:$true] %s22_s8 }
   0x9   :  { %28 = dma.hbm_to_vmem [thread:$0]  %s21_s28, 1024, %s23_s8, [#allocation4], %s471_s29, %s471_s29, %s472_s30  }
   0xa   :  { %s50_s12 = sshll.u32 %s474_s1, 4  ;;  %s51_s12 = int_to_ptr.vmem [resolvable:$true] %s50_s12 }
   0xb   :  { %56 = dma.hbm_to_vmem [thread:$0]  %s49_s11, 2048, %s51_s12, [#allocation7], %s471_s29, %s471_s29, %s472_s30  }
   0xc   :  { %462 = dma.done.wait [#allocation4], 1024  }
   0xd   :  { %463 = vsyncadd [#allocation4], 4294966272 }
   0xe   :  { %464 = dma.done.wait [#allocation7], 4096  }
   0xf   :  { %465 = vsyncadd [#allocation7], 4294963200  ;;  %v72_v0 = vld [vmem:[#allocation3] sm:$0xff]  ;;  %v74_v1 = vld [vmem:[#allocation3 + $0x10] sm:$0xff]  ;;  %vm131_vm0 = vcmask 1043456   ;;  %v475_v60 = vmov 0.0  }
  0x10   :  { %88 = vst [vmem:[#allocation1] ss:$2 sm:$0xff] %v72_v0  ;;  %v73_v2 = vld [vmem:[#allocation3 + $0x8] sm:$0xff]  ;;  %v75_v3 = vld [vmem:[#allocation3 + $0x18] sm:$0xff]  ;;  %v76_v4 = vld [vmem:[#allocation3 + $0x20] sm:$0xff]  ;;  %vm198_vm1 = vcmask 1041409  }
  0x11   :  { %96 = vst [vmem:[#allocation1 + $0x20] ss:$2 sm:$0xff] %v74_v1  ;;  %v78_v5 = vld [vmem:[#allocation3 + $0x30] sm:$0xff]  ;;  %v77_v10 = vld [vmem:[#allocation3 + $0x28] sm:$0xff]  ;;  %v79_v16 = vld [vmem:[#allocation3 + $0x38] sm:$0xff]  ;;  %vm200_vm2 = vcmask 1042434  }
  0x12   :  { %92 = vst [vmem:[#allocation1 + $0x10] ss:$2 sm:$0xff] %v73_v2  ;;  %v231_v48 = vld [vmem:[#allocation6 + $0x78] sm:$0xff]  ;;  %v230_v49 = vld [vmem:[#allocation6 + $0x70] sm:$0xff]  ;;  %v229_v50 = vld [vmem:[#allocation6 + $0x68] sm:$0xff]  ;;  %vm202_vm3 = vcmask 1043459  }
  0x13   :  { %100 = vst [vmem:[#allocation1 + $0x30] ss:$2 sm:$0xff] %v75_v3  ;;  %236 = vmatpush.msra.mxu0 %v231_v48  ;;  %v228_v51 = vld [vmem:[#allocation6 + $0x60] sm:$0xff]  ;;  %v227_v52 = vld [vmem:[#allocation6 + $0x58] sm:$0xff]  ;;  %v226_v53 = vld [vmem:[#allocation6 + $0x50] sm:$0xff]  ;;  %vm204_vm4 = vcmask 1044484  }
  0x14   :  { %v225_v54 = vld [vmem:[#allocation6 + $0x48] sm:$0xff]  ;;  %v224_v55 = vld [vmem:[#allocation6 + $0x40] sm:$0xff]  ;;  %v223_v56 = vld [vmem:[#allocation6 + $0x38] sm:$0xff]  ;;  %71 = vst [vmem:[#allocation2] sm:$0xff] %v475_v60  ;;  %vm206_vm5 = vcmask 1045509   ;;  %vm208_vm6 = vcmask 1046534  }
  0x15   :  { %237 = vmatpush.msra.mxu0 %v230_v49  ;;  %v222_v57 = vld [vmem:[#allocation6 + $0x30] sm:$0xff]  ;;  %v221_v58 = vld [vmem:[#allocation6 + $0x28] sm:$0xff]  ;;  %v220_v59 = vld [vmem:[#allocation6 + $0x20] sm:$0xff]  ;;  %vm210_vm7 = vcmask 1047559   ;;  %vm213_vm8 = vcmask 31744   ;;  %s476_s13 = smov [#allocation10]  }
  0x16   :  { %v219_v61 = vld [vmem:[#allocation6 + $0x18] sm:$0xff]  ;;  %v218_v62 = vld [vmem:[#allocation6 + $0x10] sm:$0xff]  ;;  %v217_v63 = vld [vmem:[#allocation6 + $0x8] sm:$0xff]  ;;  %s314_s14 = sshll.u32 %s476_s13, 4  ;;  %s316_s17 = sshll.u32 %s556_s6, 4  ;;  %s315_s14 = int_to_ptr.vmem [resolvable:$true] %s314_s14  ;;  %s317_s17 = int_to_ptr.hbm [resolvable:$true] %s316_s17 }
  0x17   :  { %v89_v6 = vld.sshfl [vmem:[#allocation1] sm:$0xff pattern:$0x75316420]  ;;  %v90_v7 = vld.sshfl [vmem:[#allocation1 + $0x8] sm:$0xff pattern:$0x75316420]  ;;  %238 = vmatpush.msra.mxu0 %v229_v50 }
  0x18   :  { %v132_v8 = vsel %vm131_vm0, %v89_v6, 0.0  ;;  %v133_v9 = vsel %vm131_vm0, %v90_v7, 0.0  ;;  %103 = vst [vmem:[#allocation1] ss:$2 sm:$0xff] %v76_v4  ;;  %v216_v0 = vld [vmem:[#allocation6] sm:$0xff]  ;;  %v271_v2 = vld [vmem:[#allocation8 + $0x78] sm:$0xff]  ;;  %v188_v6 = vlaneseq }
  0x19   :  { %v134_v11 = vadd.f32 %v133_v9, %v132_v8  ;;  %v97_v12 = vld.sshfl [vmem:[#allocation1 + $0x20] sm:$0xff pattern:$0x75316420]  ;;  %v98_v13 = vld.sshfl [vmem:[#allocation1 + $0x28] sm:$0xff pattern:$0x75316420]  ;;  %239 = vmatpush.msra.mxu0 %v228_v51  ;;  %276 = vmatpush.msra.mxu1 %v271_v2 }
  0x1a   :  { %v142_v14 = vsel %vm131_vm0, %v97_v12, 0.0  ;;  %v143_v15 = vsel %vm131_vm0, %v98_v13, 0.0  ;;  %109 = vst [vmem:[#allocation1 + $0x20] ss:$2 sm:$0xff] %v78_v5  ;;  %v270_v3 = vld [vmem:[#allocation8 + $0x70] sm:$0xff]  ;;  %v269_v5 = vld [vmem:[#allocation8 + $0x68] sm:$0xff] }
  0x1b   :  { %135 = vadd.xlane.f32.xlu0 %v134_v11  ;;  %v144_v17 = vadd.f32 %v143_v15, %v142_v14  ;;  %v93_v18 = vld.sshfl [vmem:[#allocation1 + $0x10] sm:$0xff pattern:$0x75316420]  ;;  %v94_v19 = vld.sshfl [vmem:[#allocation1 + $0x18] sm:$0xff pattern:$0x75316420]  ;;  %240 = vmatpush.msra.mxu0 %v227_v52 }
  0x1c   :  { %106 = vst [vmem:[#allocation1 + $0x10] ss:$2 sm:$0xff] %v77_v10  ;;  %v137_v20 = vsel %vm131_vm0, %v93_v18, 0.0  ;;  %v138_v21 = vsel %vm131_vm0, %v94_v19, 0.0  ;;  %277 = vmatpush.msra.mxu1 %v270_v3  ;;  %v268_v7 = vld [vmem:[#allocation8 + $0x60] sm:$0xff]  ;;  %v267_v8 = vld [vmem:[#allocation8 + $0x58] sm:$0xff] }
  0x1d   :  { %145 = vadd.xlane.f32.xlu1 %v144_v17  ;;  %v101_v22 = vld.sshfl [vmem:[#allocation1 + $0x30] sm:$0xff pattern:$0x75316420]  ;;  %v102_v23 = vld.sshfl [vmem:[#allocation1 + $0x38] sm:$0xff pattern:$0x75316420]  ;;  %v139_v26 = vadd.f32 %v138_v21, %v137_v20  ;;  %241 = vmatpush.msra.mxu0 %v226_v53 }
  0x1e   :  { %112 = vst [vmem:[#allocation1 + $0x30] ss:$2 sm:$0xff] %v79_v16  ;;  %v147_v24 = vsel %vm131_vm0, %v101_v22, 0.0  ;;  %v148_v25 = vsel %vm131_vm0, %v102_v23, 0.0  ;;  %278 = vmatpush.msra.mxu1 %v269_v5  ;;  %v189_v9 = vand.u32 127, %v188_v6  ;;  %v266_v14 = vld [vmem:[#allocation8 + $0x50] sm:$0xff] }
  0x1f   :  { %v104_v27 = vld.sshfl [vmem:[#allocation1] sm:$0xff pattern:$0x75316420]  ;;  %v105_v28 = vld.sshfl [vmem:[#allocation1 + $0x8] sm:$0xff pattern:$0x75316420]  ;;  %v149_v32 = vadd.f32 %v148_v25, %v147_v24  ;;  %242 = vmatpush.msra.mxu0 %v225_v54 }
  0x20   :  { %v152_v29 = vsel %vm131_vm0, %v104_v27, 0.0  ;;  %v153_v30 = vsel %vm131_vm0, %v105_v28, 0.0  ;;  %279 = vmatpush.msra.mxu1 %v268_v7  ;;  %v265_v17 = vld [vmem:[#allocation8 + $0x48] sm:$0xff]  ;;  %v264_v22 = vld [vmem:[#allocation8 + $0x40] sm:$0xff]  ;;  %v263_v27 = vld [vmem:[#allocation8 + $0x38] sm:$0xff]  ;;  %s477_s20 = smov [#allocation9]  }
  0x21   :  { %v154_v31 = vadd.f32 %v153_v30, %v152_v29  ;;  %v110_v33 = vld.sshfl [vmem:[#allocation1 + $0x20] sm:$0xff pattern:$0x75316420]  ;;  %v111_v34 = vld.sshfl [vmem:[#allocation1 + $0x28] sm:$0xff pattern:$0x75316420]  ;;  %243 = vmatpush.msra.mxu0 %v224_v55 }
  0x22   :  { %v162_v39 = vsel %vm131_vm0, %v110_v33, 0.0  ;;  %v163_v40 = vsel %vm131_vm0, %v111_v34, 0.0  ;;  %280 = vmatpush.msra.mxu1 %v267_v8  ;;  %v262_v30 = vld [vmem:[#allocation8 + $0x30] sm:$0xff]  ;;  %v257_v49 = vld [vmem:[#allocation8 + $0x8] sm:$0xff]  ;;  %v256_v50 = vld [vmem:[#allocation8] sm:$0xff]  ;;  %s303_s21 = sshll.u32 %s477_s20, 4  ;;  %s304_s21 = int_to_ptr.vmem [resolvable:$true] %s303_s21 }
  0x23   :  { %140 = vadd.xlane.f32.xlu0 %v139_v26  ;;  %155 = vadd.xlane.f32.xlu2 %v154_v31  ;;  %v107_v35 = vld.sshfl [vmem:[#allocation1 + $0x10] sm:$0xff pattern:$0x75316420]  ;;  %v108_v36 = vld.sshfl [vmem:[#allocation1 + $0x18] sm:$0xff pattern:$0x75316420]  ;;  %v164_v46 = vadd.f32 %v163_v40, %v162_v39 }
  0x24   :  { %v157_v37 = vsel %vm131_vm0, %v107_v35, 0.0  ;;  %v158_v38 = vsel %vm131_vm0, %v108_v36, 0.0  ;;  %244 = vmatpush.msra.mxu0 %v223_v56  ;;  %281 = vmatpush.msra.mxu1 %v266_v14  ;;  %v261_v36 = vld [vmem:[#allocation8 + $0x28] sm:$0xff]  ;;  %v340_v51 = vld [vmem:[%s552_s2] ss:$0 sm:$0xff]  ;;  %s305_s23 = sshll.u32 %s555_s5, 4  ;;  %s306_s23 = int_to_ptr.hbm [resolvable:$true] %s305_s23 }
  0x25   :  { %150 = vadd.xlane.f32.xlu1 %v149_v32  ;;  %v113_v41 = vld.sshfl [vmem:[#allocation1 + $0x30] sm:$0xff pattern:$0x75316420]  ;;  %v114_v42 = vld.sshfl [vmem:[#allocation1 + $0x38] sm:$0xff pattern:$0x75316420]  ;;  %v159_v45 = vadd.f32 %v158_v38, %v157_v37 }
  0x26   :  { %v167_v43 = vsel %vm131_vm0, %v113_v41, 0.0  ;;  %v168_v44 = vsel %vm131_vm0, %v114_v42, 0.0  ;;  %245 = vmatpush.msra.mxu0 %v222_v57  ;;  %282 = vmatpush.msra.mxu1 %v265_v17  ;;  %v260_v41 = vld [vmem:[#allocation8 + $0x20] sm:$0xff]  ;;  %v341_v54 = vld [vmem:[%s554_s4] ss:$0 sm:$0xff] }
  0x27   :  { %v169_v47 = vadd.f32 %v168_v44, %v167_v43 }
  0x28   :  { %246 = vmatpush.msra.mxu0 %v221_v58  ;;  %283 = vmatpush.msra.mxu1 %v264_v22 }
  0x2a   :  { %247 = vmatpush.msra.mxu0 %v220_v59  ;;  %284 = vmatpush.msra.mxu1 %v263_v27 }
  0x2b   :  { %160 = vadd.xlane.f32.xlu2 %v159_v45  ;;  %165 = vadd.xlane.f32.xlu0 %v164_v46  ;;  %v259_v45 = vld [vmem:[#allocation8 + $0x18] sm:$0xff] }
  0x2c   :  { %248 = vmatpush.msra.mxu0 %v219_v61  ;;  %285 = vmatpush.msra.mxu1 %v262_v30 }
  0x2d   :  { %170 = vadd.xlane.f32.xlu1 %v169_v47  ;;  %v258_v47 = vld [vmem:[#allocation8 + $0x10] sm:$0xff] }
  0x2e   :  { %249 = vmatpush.msra.mxu0 %v218_v62  ;;  %286 = vmatpush.msra.mxu1 %v261_v36 }
  0x30   :  { %250 = vmatpush.msra.mxu0 %v217_v63  ;;  %287 = vmatpush.msra.mxu1 %v260_v41 }
  0x32   :  { %251 = vmatpush.msra.mxu0 %v216_v0  ;;  %288 = vmatpush.msra.mxu1 %v259_v45 }
  0x34   :  { %289 = vmatpush.msra.mxu1 %v258_v47 }
  0x36   :  { %290 = vmatpush.msra.mxu1 %v257_v49 }
  0x38   :  { %291 = vmatpush.msra.mxu1 %v256_v50 }
  0x8e   :  { %v136_v1 = vpop.xlane.xlu0 %135 }
  0x8f   :  { %v172_v10 = vmul.f32 0.00390625, %v136_v1 }
  0x90   :  { %v146_v4 = vpop.xlane.xlu1 %145 }
  0x91   :  { %v174_v11 = vmul.f32 0.00390625, %v146_v4  ;;  %v190_v18 = vperm.slane %v172_v10, %v189_v9 }
  0x93   :  { %v192_v21 = vperm.slane %v174_v11, %v189_v9 }
  0x96   :  { %v141_v12 = vpop.xlane.xlu0 %140  ;;  %v156_v13 = vpop.xlane.xlu2 %155 }
  0x97   :  { %v173_v15 = vmul.f32 0.00390625, %v141_v12  ;;  %v176_v25 = vmul.f32 0.00390625, %v156_v13 }
  0x98   :  { %v151_v16 = vpop.xlane.xlu1 %150 }
  0x99   :  { %v191_v19 = vperm.slane %v173_v15, %v189_v9  ;;  %v175_v20 = vmul.f32 0.00390625, %v151_v16  ;;  %v194_v34 = vperm.slane %v176_v25, %v189_v9 }
  0x9b   :  { %v199_v23 = vsel %vm198_vm1, %v191_v19, %v190_v18  ;;  %v193_v24 = vperm.slane %v175_v20, %v189_v9 }
  0x9c   :  { %v201_v26 = vsel %vm200_vm2, %v192_v21, %v199_v23 }
  0x9d   :  { %v203_v31 = vsel %vm202_vm3, %v193_v24, %v201_v26 }
  0x9e   :  { %v161_v28 = vpop.xlane.xlu2 %160  ;;  %v166_v29 = vpop.xlane.xlu0 %165  ;;  %v205_v40 = vsel %vm204_vm4, %v194_v34, %v203_v31 }
  0x9f   :  { %v177_v32 = vmul.f32 0.00390625, %v161_v28  ;;  %v178_v33 = vmul.f32 0.00390625, %v166_v29 }
  0xa0   :  { %v171_v35 = vpop.xlane.xlu1 %170 }
  0xa1   :  { %v195_v37 = vperm.slane %v177_v32, %v189_v9  ;;  %v196_v38 = vperm.slane %v178_v33, %v189_v9  ;;  %v179_v39 = vmul.f32 0.00390625, %v171_v35 }
  0xa3   :  { %v207_v42 = vsel %vm206_vm5, %v195_v37, %v205_v40  ;;  %v197_v43 = vperm.slane %v179_v39, %v189_v9 }
  0xa4   :  { %v209_v44 = vsel %vm208_vm6, %v196_v38, %v207_v42 }
  0xa5   :  { %v211_v46 = vsel %vm210_vm7, %v197_v43, %v209_v44 }
  0xa6   :  { %214 = vst.msk [vmem:[#allocation2] sm:$0xff] %vm213_vm8, %v211_v46 }
  0xad   :  { %v215_v48 = vld [vmem:[#allocation2] sm:$0xff] }
  0xae   :  { %252 = vmatmul.f32.vlgmr.msra.gmra.mxu0 %v215_v48 }
 0x12b   :  { %v253_v52 = vpop.f32.mrf.mxu0 }
 0x12c   :  { %v254_v53 = vadd.f32 %v340_v51, %v253_v52 }
 0x12e   :  { %297 = vst [vmem:[#allocation10] sm:$0xff] %v254_v53  ;;  %292 = vmatmul.f32.vlgmr.msra.gmra.mxu1 %v254_v53 }
 0x12f   :  { %319 = dma.vmem_to_hbm [thread:$0]  %s315_s14, 128, %s317_s17, [#allocation11]  }
 0x1ab   :  { %v293_v55 = vpop.f32.mrf.mxu1 }
 0x1ac   :  { %v294_v56 = vadd.f32 %v341_v54, %v293_v55 }
 0x1ae   :  { %296 = vst [vmem:[#allocation9] sm:$0xff] %v294_v56 }
 0x1af   :  { %308 = dma.vmem_to_hbm [thread:$0]  %s304_s21, 128, %s306_s23, [#allocation5]  }
 0x1b0   :  { %466 = dma.done.wait [#allocation5], 128  }
 0x1b1   :  { %467 = vsyncadd [#allocation5], 4294967168 }
 0x1b2   :  { %468 = dma.done.wait [#allocation11], 128  }
 0x1b3   :  { %469 = vsyncadd [#allocation11], 4294967168 }
 0x1b4   :  { %328 = vsyncpa [#allocation4], 1 }
 0x1b5   :  { %329 = vsyncpa [#allocation7], 1 }
 0x1b6   :  { %330 = vsyncpa [#allocation5], 1 }
 0x1b7   :  { %331 = vsyncpa [#allocation11], 1 }

</bundles_post_ra>
